<compile_context>
chip_gen: v7x
topology: tpu7x:2x2x1
jax: 0.10.0
libtpu: 0.0.40
codegen_flags: <defaults>
</compile_context>

<pallas_src>
import numpy as np
import jax
import jax.numpy as jnp
from jax.experimental import pallas as pl
from jax.experimental.pallas import tpu as pltpu

IN_FEATURES = 3
LATENT = 3
HIDDEN = 4 * IN_FEATURES

FPAD = 128            # lane padding for every feature dimension
FPAD2 = 2 * FPAD      # fused [mu | logvar] width
SUBL = 8              # sublane quantum


def _round_up(n, m):
    return ((n + m - 1) // m) * m


def _pad2(a, rows, cols):
    r, c = a.shape
    return jnp.pad(a, ((0, rows - r), (0, cols - c)))


# ------------------------------- kernel -------------------------------------

def vae_kernel(x_ref, eps_ref, w_ref, wmlv_ref, b_ref, bmlv_ref,
               recon_ref, mu_ref, logvar_ref):
    """One batch tile of the full VAE forward.

    x_ref, eps_ref : (TB, 128)  f32
    w_ref          : (5, 128, 128) bf16  -- rows: enc1, enc2, dec1, dec2, dec3
    wmlv_ref       : (128, 256) bf16     -- fused [W_mu | W_logvar]
    b_ref          : (8, 128)   f32      -- rows 0..4: enc1, enc2, dec1, dec2, dec3
    bmlv_ref       : (1, 256)   f32      -- fused [b_mu | b_logvar]
    """
    def dense(h, layer, relu=True):
        y = jnp.dot(h.astype(jnp.bfloat16), w_ref[layer],
                    preferred_element_type=jnp.float32)
        y = y + b_ref[layer:layer + 1, :]
        return jnp.maximum(y, 0.0) if relu else y

    x = x_ref[...]
    eps = eps_ref[...]

    # ---- encoder ----
    h = dense(x, 0)        # enc1 + ReLU
    h = dense(h, 1)        # enc2 + ReLU

    # fused enc3: one 256-lane matmul, then a lane-aligned (free) split
    mlv = jnp.dot(h.astype(jnp.bfloat16), wmlv_ref[...],
                  preferred_element_type=jnp.float32) + bmlv_ref[...]
    mu = mlv[:, :FPAD]
    logvar = mlv[:, FPAD:]

    # ---- reparameterize: z = mu + eps * exp(0.5 * logvar) ----
    # padded lanes stay inert: mu = logvar = eps = 0 there -> z = 0.
    z = mu + eps * jnp.exp(0.5 * logvar)

    # ---- decoder ----
    d = dense(z, 2)        # dec1 + ReLU
    d = dense(d, 3)        # dec2 + ReLU
    logits = dense(d, 4, relu=False)   # dec3

    # 2*sigmoid(t) - 1 == tanh(t/2): one EUP transcendental
    recon_ref[...] = jnp.tanh(0.5 * logits)
    mu_ref[...] = mu
    logvar_ref[...] = logvar


# -------------------------- parameter handling ------------------------------

def make_params(key):
    """Raw (un-padded) parameters matching the PyTorch module layout,
    pre-transposed so y = x @ W + b."""
    dims = [
        (IN_FEATURES, HIDDEN),    # enc1
        (HIDDEN, HIDDEN),         # enc2
        (HIDDEN, 2 * LATENT),     # enc3 -> [mu | logvar]
        (LATENT, HIDDEN),         # dec1
        (HIDDEN, HIDDEN),         # dec2
        (HIDDEN, IN_FEATURES),    # dec3
    ]
    params = []
    for fi, fo in dims:
        key, kw, kb = jax.random.split(key, 3)
        bound_w = np.sqrt(6.0 / (fi + fo))               # xavier_uniform
        w = jax.random.uniform(kw, (fi, fo), jnp.float32, -bound_w, bound_w)
        bound_b = 1.0 / np.sqrt(fi)                      # default Linear bias init
        b = jax.random.uniform(kb, (fo,), jnp.float32, -bound_b, bound_b)
        params.append((w, b))
    return params


def pack_params(params):
    """Pad + stack + bf16-cast ONCE at init time (not inside the forward)."""
    (w1, b1), (w2, b2), (w3, b3), (wd1, bd1), (wd2, bd2), (wd3, bd3) = params

    # five 128x128 weights, stacked; bf16 halves weight DMA bytes
    w_stack = jnp.stack([
        _pad2(w1, FPAD, FPAD), _pad2(w2, FPAD, FPAD),
        _pad2(wd1, FPAD, FPAD), _pad2(wd2, FPAD, FPAD),
        _pad2(wd3, FPAD, FPAD),
    ]).astype(jnp.bfloat16)

    # fused enc3 weight: [W_mu | W_logvar] -> (128, 256)
    wmu, wlv = w3[:, :LATENT], w3[:, LATENT:]
    w_mlv = jnp.concatenate(
        [_pad2(wmu, FPAD, FPAD), _pad2(wlv, FPAD, FPAD)], axis=1
    ).astype(jnp.bfloat16)

    # biases: rows 0..4 of one (8, 128) f32 array
    b_stack = jnp.zeros((SUBL, FPAD), jnp.float32)
    for row, b in enumerate([b1, b2, bd1, bd2, bd3]):
        b_stack = b_stack.at[row, :b.shape[0]].set(b)

    # fused enc3 bias: [b_mu | b_logvar] -> (1, 256)
    bmu, blv = b3[:LATENT], b3[LATENT:]
    b_mlv = jnp.concatenate(
        [jnp.pad(bmu, (0, FPAD - LATENT)), jnp.pad(blv, (0, FPAD - LATENT))]
    ).reshape(1, FPAD2)

    return w_stack, w_mlv, b_stack, b_mlv


# ------------------------------- wrapper -------------------------------------

def vae_forward(x, eps, packed, *, batch_tile=256):
    """x: (B, IN_FEATURES), eps: (B, LATENT). Returns (recon, x, mu, logvar)."""
    w_stack, w_mlv, b_stack, b_mlv = packed

    B = x.shape[0]
    TB = min(batch_tile, _round_up(B, SUBL))   # batch tile (multiple of 8)
    B_pad = _round_up(B, TB)
    grid = (B_pad // TB,)

    x_p = jnp.pad(x.astype(jnp.float32),
                  ((0, B_pad - B), (0, FPAD - x.shape[1])))
    eps_p = jnp.pad(eps.astype(jnp.float32),
                    ((0, B_pad - B), (0, FPAD - eps.shape[1])))

    batch_spec = pl.BlockSpec((TB, FPAD), lambda i: (i, 0))
    in_specs = [
        batch_spec,                                          # x
        batch_spec,                                          # eps
        pl.BlockSpec((5, FPAD, FPAD), lambda i: (0, 0, 0)),  # resident weights
        pl.BlockSpec((FPAD, FPAD2), lambda i: (0, 0)),       # resident enc3 weight
        pl.BlockSpec((SUBL, FPAD), lambda i: (0, 0)),        # resident biases
        pl.BlockSpec((1, FPAD2), lambda i: (0, 0)),          # resident enc3 bias
    ]
    out_specs = [batch_spec, batch_spec, batch_spec]
    out_shape = [jax.ShapeDtypeStruct((B_pad, FPAD), jnp.float32)] * 3

    # advisory cost hint so XLA schedules the custom call sensibly
    flops = 2 * B_pad * (5 * FPAD * FPAD + FPAD * FPAD2)
    bytes_accessed = sum(int(a.size) * a.dtype.itemsize
                         for a in (x_p, eps_p, w_stack, w_mlv, b_stack, b_mlv))
    bytes_accessed += 3 * B_pad * FPAD * 4
    cost = pl.CostEstimate(flops=flops,
                           transcendentals=2 * B_pad * FPAD,
                           bytes_accessed=bytes_accessed)

    recon_p, mu_p, logvar_p = pl.pallas_call(
        vae_kernel,
        out_shape=out_shape,
        grid=grid,
        in_specs=in_specs,
        out_specs=out_specs,
        compiler_params=pltpu.CompilerParams(
            dimension_semantics=("parallel",)),
        cost_estimate=cost,
    )(x_p, eps_p, w_stack, w_mlv, b_stack, b_mlv)

    recon = recon_p[:B, :IN_FEATURES]
    mu = mu_p[:B, :LATENT]
    logvar = logvar_p[:B, :LATENT]
    return recon, x, mu, logvar


# ------------------------------- reference -----------------------------------

def reference_forward(x, eps, params):
    (w1, b1), (w2, b2), (w3, b3), (wd1, bd1), (wd2, bd2), (wd3, bd3) = params
    h1 = jax.nn.relu(x @ w1 + b1)
    h2 = jax.nn.relu(h1 @ w2 + b2)
    y = h2 @ w3 + b3
    mu, logvar = y[:, :LATENT], y[:, LATENT:]
    z = mu + eps * jnp.exp(0.5 * logvar)
    d1 = jax.nn.relu(z @ wd1 + bd1)
    d2 = jax.nn.relu(d1 @ wd2 + bd2)
    recon = 2.0 * jax.nn.sigmoid(d2 @ wd3 + bd3) - 1.0
    return recon, x, mu, logvar


if __name__ == "__main__":
    key = jax.random.PRNGKey(0)
    k_params, k_data = jax.random.split(key)

    params = make_params(k_params)
    packed = jax.block_until_ready(pack_params(params))   # padded/stacked ONCE

    # bf16 matmul inputs (f32 accumulation) -> looser tolerance than pure f32
    TOL = dict(atol=5e-2, rtol=5e-2)

    # small batch (single tile) and a larger batch exercising the multi-step grid
    for B in (4, 600):
        kx, ke = jax.random.split(jax.random.fold_in(k_data, B))
        x = jax.random.normal(kx, (B, IN_FEATURES), jnp.float32)
        # eps plays the role of torch.randn_like(std) in reparameterize; drawn
        # outside the kernel so the forward is deterministic in (x, eps, params).
        eps = jax.random.normal(ke, (B, LATENT), jnp.float32)

        recon, x_out, mu, logvar = vae_forward(x, eps, packed)
        jax.block_until_ready((recon, x_out, mu, logvar))

        r_recon, _, r_mu, r_logvar = reference_forward(x, eps, params)
        np.testing.assert_allclose(np.asarray(recon), np.asarray(r_recon), **TOL)
        np.testing.assert_allclose(np.asarray(mu), np.asarray(r_mu), **TOL)
        np.testing.assert_allclose(np.asarray(logvar), np.asarray(r_logvar), **TOL)

    print("KERNEL_OK")
</pallas_src>

<mosaic_0001>
module attributes {stable_mosaic.version = 11 : i64} {
  func.func @vae_kernel(%arg0: i32, %arg1: memref<8x128xf32, #tpu.memory_space<vmem>>, %arg2: memref<8x128xf32, #tpu.memory_space<vmem>>, %arg3: memref<5x128x128xbf16, #tpu.memory_space<vmem>>, %arg4: memref<128x256xbf16, #tpu.memory_space<vmem>>, %arg5: memref<8x128xf32, #tpu.memory_space<vmem>>, %arg6: memref<1x256xf32, #tpu.memory_space<vmem>>, %arg7: memref<8x128xf32, #tpu.memory_space<vmem>>, %arg8: memref<8x128xf32, #tpu.memory_space<vmem>>, %arg9: memref<8x128xf32, #tpu.memory_space<vmem>>) attributes {dimension_semantics = [#tpu.dimension_semantics<parallel>], iteration_bounds = array<i64: 1>, scalar_prefetch = 0 : i64, scratch_operands = 0 : i64, tpu.core_type = #tpu.core_type<tc>, window_params = [{transform_indices = @transform_0, window_bounds = array<i64: 8, 128>}, {transform_indices = @transform_1, window_bounds = array<i64: 8, 128>}, {pipeline_mode = #tpu.pipeline_mode<synchronous>, transform_indices = @transform_2, window_bounds = array<i64: 5, 128, 128>}, {pipeline_mode = #tpu.pipeline_mode<synchronous>, transform_indices = @transform_3, window_bounds = array<i64: 128, 256>}, {pipeline_mode = #tpu.pipeline_mode<synchronous>, transform_indices = @transform_4, window_bounds = array<i64: 8, 128>}, {pipeline_mode = #tpu.pipeline_mode<synchronous>, transform_indices = @transform_5, window_bounds = array<i64: 1, 256>}, {transform_indices = @transform_6, window_bounds = array<i64: 8, 128>}, {transform_indices = @transform_7, window_bounds = array<i64: 8, 128>}, {transform_indices = @transform_8, window_bounds = array<i64: 8, 128>}]} {
    %c0 = arith.constant 0 : index
    %c0_0 = arith.constant 0 : index
    %0 = vector.load %arg1[%c0, %c0_0] : memref<8x128xf32, #tpu.memory_space<vmem>>, vector<8x128xf32>
    %c0_1 = arith.constant 0 : index
    %c0_2 = arith.constant 0 : index
    %1 = vector.load %arg2[%c0_1, %c0_2] : memref<8x128xf32, #tpu.memory_space<vmem>>, vector<8x128xf32>
    %2 = arith.truncf %0 : vector<8x128xf32> to vector<8x128xbf16>
    %c0_3 = arith.constant 0 : index
    %c0_4 = arith.constant 0 : index
    %c0_5 = arith.constant 0 : index
    %3 = vector.load %arg3[%c0_3, %c0_4, %c0_5] : memref<5x128x128xbf16, #tpu.memory_space<vmem>>, vector<1x128x128xbf16>
    %4 = vector.shape_cast %3 : vector<1x128x128xbf16> to vector<128x128xbf16>
    %cst = arith.constant dense<0.000000e+00> : vector<8x128xf32>
    %5 = tpu.matmul %2, %4, %cst {dimension_numbers = #tpu.dot_dimension_numbers<[1], [0], [0], [1], [0, 0, 1, 1], [], []>} : vector<8x128xbf16>, vector<128x128xbf16>, vector<8x128xf32> -> vector<8x128xf32>
    %c0_6 = arith.constant 0 : index
    %c0_7 = arith.constant 0 : index
    %6 = vector.load %arg5[%c0_6, %c0_7] : memref<8x128xf32, #tpu.memory_space<vmem>>, vector<1x128xf32>
    %7 = vector.broadcast %6 : vector<1x128xf32> to vector<8x128xf32>
    %8 = arith.addf %5, %7 : vector<8x128xf32>
    %cst_8 = arith.constant 0.000000e+00 : f32
    %9 = vector.broadcast %cst_8 : f32 to vector<8x128xf32>
    %10 = arith.maximumf %8, %9 : vector<8x128xf32>
    %11 = arith.truncf %10 : vector<8x128xf32> to vector<8x128xbf16>
    %c1 = arith.constant 1 : index
    %c0_9 = arith.constant 0 : index
    %c0_10 = arith.constant 0 : index
    %12 = vector.load %arg3[%c1, %c0_9, %c0_10] : memref<5x128x128xbf16, #tpu.memory_space<vmem>>, vector<1x128x128xbf16>
    %13 = vector.shape_cast %12 : vector<1x128x128xbf16> to vector<128x128xbf16>
    %cst_11 = arith.constant dense<0.000000e+00> : vector<8x128xf32>
    %14 = tpu.matmul %11, %13, %cst_11 {dimension_numbers = #tpu.dot_dimension_numbers<[1], [0], [0], [1], [0, 0, 1, 1], [], []>} : vector<8x128xbf16>, vector<128x128xbf16>, vector<8x128xf32> -> vector<8x128xf32>
    %c1_12 = arith.constant 1 : index
    %c0_13 = arith.constant 0 : index
    %15 = vector.load %arg5[%c1_12, %c0_13] : memref<8x128xf32, #tpu.memory_space<vmem>>, vector<1x128xf32>
    %16 = vector.broadcast %15 : vector<1x128xf32> to vector<8x128xf32>
    %17 = arith.addf %14, %16 : vector<8x128xf32>
    %cst_14 = arith.constant 0.000000e+00 : f32
    %18 = vector.broadcast %cst_14 : f32 to vector<8x128xf32>
    %19 = arith.maximumf %17, %18 : vector<8x128xf32>
    %20 = arith.truncf %19 : vector<8x128xf32> to vector<8x128xbf16>
    %c0_15 = arith.constant 0 : index
    %c0_16 = arith.constant 0 : index
    %21 = vector.load %arg4[%c0_15, %c0_16] : memref<128x256xbf16, #tpu.memory_space<vmem>>, vector<128x256xbf16>
    %cst_17 = arith.constant dense<0.000000e+00> : vector<8x256xf32>
    %22 = tpu.matmul %20, %21, %cst_17 {dimension_numbers = #tpu.dot_dimension_numbers<[1], [0], [0], [1], [0, 0, 1, 1], [], []>} : vector<8x128xbf16>, vector<128x256xbf16>, vector<8x256xf32> -> vector<8x256xf32>
    %c0_18 = arith.constant 0 : index
    %c0_19 = arith.constant 0 : index
    %23 = vector.load %arg6[%c0_18, %c0_19] : memref<1x256xf32, #tpu.memory_space<vmem>>, vector<1x256xf32>
    %24 = vector.broadcast %23 : vector<1x256xf32> to vector<8x256xf32>
    %25 = arith.addf %22, %24 : vector<8x256xf32>
    %26 = vector.extract_strided_slice %25 {offsets = [0, 0], sizes = [8, 128], strides = [1, 1]} : vector<8x256xf32> to vector<8x128xf32>
    %27 = vector.extract_strided_slice %25 {offsets = [0, 128], sizes = [8, 128], strides = [1, 1]} : vector<8x256xf32> to vector<8x128xf32>
    %cst_20 = arith.constant 5.000000e-01 : f32
    %28 = vector.broadcast %cst_20 : f32 to vector<8x128xf32>
    %29 = arith.mulf %28, %27 : vector<8x128xf32>
    %30 = math.exp %29 : vector<8x128xf32>
    %31 = arith.mulf %1, %30 : vector<8x128xf32>
    %32 = arith.addf %26, %31 : vector<8x128xf32>
    %33 = arith.truncf %32 : vector<8x128xf32> to vector<8x128xbf16>
    %c2 = arith.constant 2 : index
    %c0_21 = arith.constant 0 : index
    %c0_22 = arith.constant 0 : index
    %34 = vector.load %arg3[%c2, %c0_21, %c0_22] : memref<5x128x128xbf16, #tpu.memory_space<vmem>>, vector<1x128x128xbf16>
    %35 = vector.shape_cast %34 : vector<1x128x128xbf16> to vector<128x128xbf16>
    %cst_23 = arith.constant dense<0.000000e+00> : vector<8x128xf32>
    %36 = tpu.matmul %33, %35, %cst_23 {dimension_numbers = #tpu.dot_dimension_numbers<[1], [0], [0], [1], [0, 0, 1, 1], [], []>} : vector<8x128xbf16>, vector<128x128xbf16>, vector<8x128xf32> -> vector<8x128xf32>
    %c2_24 = arith.constant 2 : index
    %c0_25 = arith.constant 0 : index
    %37 = vector.load %arg5[%c2_24, %c0_25] : memref<8x128xf32, #tpu.memory_space<vmem>>, vector<1x128xf32>
    %38 = vector.broadcast %37 : vector<1x128xf32> to vector<8x128xf32>
    %39 = arith.addf %36, %38 : vector<8x128xf32>
    %cst_26 = arith.constant 0.000000e+00 : f32
    %40 = vector.broadcast %cst_26 : f32 to vector<8x128xf32>
    %41 = arith.maximumf %39, %40 : vector<8x128xf32>
    %42 = arith.truncf %41 : vector<8x128xf32> to vector<8x128xbf16>
    %c3 = arith.constant 3 : index
    %c0_27 = arith.constant 0 : index
    %c0_28 = arith.constant 0 : index
    %43 = vector.load %arg3[%c3, %c0_27, %c0_28] : memref<5x128x128xbf16, #tpu.memory_space<vmem>>, vector<1x128x128xbf16>
    %44 = vector.shape_cast %43 : vector<1x128x128xbf16> to vector<128x128xbf16>
    %cst_29 = arith.constant dense<0.000000e+00> : vector<8x128xf32>
    %45 = tpu.matmul %42, %44, %cst_29 {dimension_numbers = #tpu.dot_dimension_numbers<[1], [0], [0], [1], [0, 0, 1, 1], [], []>} : vector<8x128xbf16>, vector<128x128xbf16>, vector<8x128xf32> -> vector<8x128xf32>
    %c3_30 = arith.constant 3 : index
    %c0_31 = arith.constant 0 : index
    %46 = vector.load %arg5[%c3_30, %c0_31] : memref<8x128xf32, #tpu.memory_space<vmem>>, vector<1x128xf32>
    %47 = vector.broadcast %46 : vector<1x128xf32> to vector<8x128xf32>
    %48 = arith.addf %45, %47 : vector<8x128xf32>
    %cst_32 = arith.constant 0.000000e+00 : f32
    %49 = vector.broadcast %cst_32 : f32 to vector<8x128xf32>
    %50 = arith.maximumf %48, %49 : vector<8x128xf32>
    %51 = arith.truncf %50 : vector<8x128xf32> to vector<8x128xbf16>
    %c4 = arith.constant 4 : index
    %c0_33 = arith.constant 0 : index
    %c0_34 = arith.constant 0 : index
    %52 = vector.load %arg3[%c4, %c0_33, %c0_34] : memref<5x128x128xbf16, #tpu.memory_space<vmem>>, vector<1x128x128xbf16>
    %53 = vector.shape_cast %52 : vector<1x128x128xbf16> to vector<128x128xbf16>
    %cst_35 = arith.constant dense<0.000000e+00> : vector<8x128xf32>
    %54 = tpu.matmul %51, %53, %cst_35 {dimension_numbers = #tpu.dot_dimension_numbers<[1], [0], [0], [1], [0, 0, 1, 1], [], []>} : vector<8x128xbf16>, vector<128x128xbf16>, vector<8x128xf32> -> vector<8x128xf32>
    %c4_36 = arith.constant 4 : index
    %c0_37 = arith.constant 0 : index
    %55 = vector.load %arg5[%c4_36, %c0_37] : memref<8x128xf32, #tpu.memory_space<vmem>>, vector<1x128xf32>
    %56 = vector.broadcast %55 : vector<1x128xf32> to vector<8x128xf32>
    %57 = arith.addf %54, %56 : vector<8x128xf32>
    %cst_38 = arith.constant 5.000000e-01 : f32
    %58 = vector.broadcast %cst_38 : f32 to vector<8x128xf32>
    %59 = arith.mulf %58, %57 : vector<8x128xf32>
    %60 = math.tanh %59 : vector<8x128xf32>
    %c0_39 = arith.constant 0 : index
    %c0_40 = arith.constant 0 : index
    %61 = vector.load %arg7[%c0_39, %c0_40] : memref<8x128xf32, #tpu.memory_space<vmem>>, vector<8x128xf32>
    tpu.vector_store %arg7[%c0_39, %c0_40], %60 {strides = array<i32>} : memref<8x128xf32, #tpu.memory_space<vmem>>, vector<8x128xf32>,
    %c0_41 = arith.constant 0 : index
    %c0_42 = arith.constant 0 : index
    %62 = vector.load %arg8[%c0_41, %c0_42] : memref<8x128xf32, #tpu.memory_space<vmem>>, vector<8x128xf32>
    tpu.vector_store %arg8[%c0_41, %c0_42], %26 {strides = array<i32>} : memref<8x128xf32, #tpu.memory_space<vmem>>, vector<8x128xf32>,
    %c0_43 = arith.constant 0 : index
    %c0_44 = arith.constant 0 : index
    %63 = vector.load %arg9[%c0_43, %c0_44] : memref<8x128xf32, #tpu.memory_space<vmem>>, vector<8x128xf32>
    tpu.vector_store %arg9[%c0_43, %c0_44], %27 {strides = array<i32>} : memref<8x128xf32, #tpu.memory_space<vmem>>, vector<8x128xf32>,
    return
  }
  func.func @transform_0(%arg0: i32) -> (i32, i32) {
    %c0_i32 = arith.constant 0 : i32
    %c0_i32_0 = arith.constant 0 : i32
    return %arg0, %c0_i32 : i32, i32
  }
  func.func @transform_1(%arg0: i32) -> (i32, i32) {
    %c0_i32 = arith.constant 0 : i32
    %c0_i32_0 = arith.constant 0 : i32
    return %arg0, %c0_i32 : i32, i32
  }
  func.func @transform_2(%arg0: i32) -> (i32, i32, i32) {
    %c0_i32 = arith.constant 0 : i32
    %c0_i32_0 = arith.constant 0 : i32
    %c0_i32_1 = arith.constant 0 : i32
    %c0_i32_2 = arith.constant 0 : i32
    return %c0_i32, %c0_i32_0, %c0_i32_1 : i32, i32, i32
  }
  func.func @transform_3(%arg0: i32) -> (i32, i32) {
    %c0_i32 = arith.constant 0 : i32
    %c0_i32_0 = arith.constant 0 : i32
    %c0_i32_1 = arith.constant 0 : i32
    return %c0_i32, %c0_i32_0 : i32, i32
  }
  func.func @transform_4(%arg0: i32) -> (i32, i32) {
    %c0_i32 = arith.constant 0 : i32
    %c0_i32_0 = arith.constant 0 : i32
    %c0_i32_1 = arith.constant 0 : i32
    return %c0_i32, %c0_i32_0 : i32, i32
  }
  func.func @transform_5(%arg0: i32) -> (i32, i32) {
    %c0_i32 = arith.constant 0 : i32
    %c0_i32_0 = arith.constant 0 : i32
    %c0_i32_1 = arith.constant 0 : i32
    return %c0_i32, %c0_i32_0 : i32, i32
  }
  func.func @transform_6(%arg0: i32) -> (i32, i32) {
    %c0_i32 = arith.constant 0 : i32
    %c0_i32_0 = arith.constant 0 : i32
    return %arg0, %c0_i32 : i32, i32
  }
  func.func @transform_7(%arg0: i32) -> (i32, i32) {
    %c0_i32 = arith.constant 0 : i32
    %c0_i32_0 = arith.constant 0 : i32
    return %arg0, %c0_i32 : i32, i32
  }
  func.func @transform_8(%arg0: i32) -> (i32, i32) {
    %c0_i32 = arith.constant 0 : i32
    %c0_i32_0 = arith.constant 0 : i32
    return %arg0, %c0_i32 : i32, i32
  }
}

</mosaic_0001>

<bundles_post_ra>
// kernel: tpu_custom_call.1
= control target key start
LH: loop header
LB: loop body
LE: loop exit
PB: predicated region body
PF: predicated region fallthrough
CT: control target
= control target key end

     0   :  { %14 = vsyncpa [#allocation3], 0  ;;  %s1507_s0 = inlined_call_operand.hbm [shape: f32[8,128], index: 0, kind: input, shape index: {}]   ;;  %s1508_s1 = inlined_call_operand.hbm [shape: f32[8,128], index: 1, kind: input, shape index: {}]   ;;  %s1509_s2 = inlined_call_operand.hbm [shape: bf16[5,128,128], index: 2, kind: input, shape index: {}]   ;;  %s1510_s3 = inlined_call_operand.hbm [shape: bf16[128,256], index: 3, kind: input, shape index: {}]   ;;  %s1511_s4 = inlined_call_operand.vmem [shape: f32[8,128], index: 4, kind: input, shape index: {}]   ;;  %s1512_s5 = inlined_call_operand.vmem [shape: f32[1,256], index: 5, kind: input, shape index: {}]   ;;  %s1513_s6 = inlined_call_operand.hbm [shape: f32[8,128], index: 6, kind: output, shape index: {0}]   ;;  %s1514_s7 = inlined_call_operand.hbm [shape: f32[8,128], index: 7, kind: output, shape index: {1}]   ;;  %s1515_s8 = inlined_call_operand.hbm [shape: f32[8,128], index: 8, kind: output, shape index: {2}]  }
   0x1   :  { %15 = vsyncpa [#allocation6], 0 }
   0x2   :  { %16 = vsyncpa [#allocation9], 0 }
   0x3   :  { %17 = vsyncpa [#allocation4], 0 }
   0x4   :  { %18 = vsyncpa [#allocation12], 0  ;;  %s1296_s27 = smov [#allocation5]   ;;  %s1297_s29 = smov [#allocation2]  }
   0x5   :  { %s35_s28 = sshll.u32 %s1296_s27, 4  ;;  %s25_s30 = sshll.u32 %s1297_s29, 4  ;;  %s36_s28 = int_to_ptr.vmem [resolvable:$true] %s35_s28  ;;  %s26_s30 = int_to_ptr.vmem [resolvable:$true] %s25_s30 }
   0x6   :  { %s1132_s11 = scalar_lea.hbm %s1508_s1, 128 }
   0x7   :  { %p1133_p0 = scmp.ne.s32.totalorder %s1508_s1, %s1132_s11  ;;  %p1136_p1 = scmp.lt.u32.totalorder %s1132_s11, %s1508_s1 }
   0x9   :  { %p1138_p2 = pnand %p1136_p1, %p1133_p0 }
   0xb   :  { %1141 = shalt.err (!%p1138_p2)
}
   0xc   :  { %s1142_s16 = scalar_lea.vmem %s36_s28, 128  ;;  %p1147_p4 = scmp.lt.s32.totalorder %s36_s28, %s36_s28 }
   0xd   :  { %p1143_p3 = scmp.ne.s32.totalorder %s36_s28, %s1142_s16  ;;  %p1148_p5 = scmp.lt.s32.totalorder %s1142_s16, %s1142_s16 }
   0xf   :  { %p1149_p6 = por %p1148_p5, %p1147_p4 }
  0x11   :  { %p1150_p7 = pnand %p1149_p6, %p1143_p3 }
  0x13   :  { %1153 = shalt.err (!%p1150_p7)
}
  0x14   :  { %38 = dma.hbm_to_vmem [thread:$0]  %s1508_s1, 128, %s36_s28, [#allocation6]  }
  0x15   :  { %s1154_s21 = scalar_lea.hbm %s1507_s0, 128 }
  0x16   :  { %p1155_p8 = scmp.ne.s32.totalorder %s1507_s0, %s1154_s21  ;;  %p1158_p9 = scmp.lt.u32.totalorder %s1154_s21, %s1507_s0 }
  0x18   :  { %p1160_p10 = pnand %p1158_p9, %p1155_p8 }
  0x1a   :  { %1163 = shalt.err (!%p1160_p10)
}
  0x1b   :  { %s1164_s26 = scalar_lea.vmem %s26_s30, 128  ;;  %p1169_p12 = scmp.lt.s32.totalorder %s26_s30, %s26_s30 }
  0x1c   :  { %p1165_p11 = scmp.ne.s32.totalorder %s26_s30, %s1164_s26  ;;  %p1170_p13 = scmp.lt.s32.totalorder %s1164_s26, %s1164_s26 }
  0x1e   :  { %p1171_p0 = por %p1170_p13, %p1169_p12 }
  0x20   :  { %p1172_p1 = pnand %p1171_p0, %p1165_p11 }
  0x22   :  { %1175 = shalt.err (!%p1172_p1)
}
  0x23   :  { %28 = dma.hbm_to_vmem [thread:$0]  %s1507_s0, 128, %s26_s30, [#allocation3]  }
  0x24   :  { %s1298_s28 = smov [#allocation7]   ;;  %s1176_s11 = scalar_lea.hbm %s1509_s2, 5120 }
  0x25   :  { %s44_s29 = sshll.u32 %s1298_s28, 4  ;;  %p1177_p2 = scmp.ne.s32.totalorder %s1509_s2, %s1176_s11  ;;  %s45_s29 = int_to_ptr.vmem [resolvable:$true] %s44_s29 }
  0x26   :  { %p1180_p3 = scmp.lt.u32.totalorder %s1176_s11, %s1509_s2 }
  0x28   :  { %p1182_p4 = pnand %p1180_p3, %p1177_p2 }
  0x2a   :  { %1185 = shalt.err (!%p1182_p4)
}
  0x2b   :  { %s1186_s16 = scalar_lea.vmem %s45_s29, 5120  ;;  %p1191_p6 = scmp.lt.s32.totalorder %s45_s29, %s45_s29 }
  0x2c   :  { %p1187_p5 = scmp.ne.s32.totalorder %s45_s29, %s1186_s16  ;;  %p1192_p7 = scmp.lt.s32.totalorder %s1186_s16, %s1186_s16 }
  0x2e   :  { %p1193_p8 = por %p1192_p7, %p1191_p6 }
  0x30   :  { %p1194_p9 = pnand %p1193_p8, %p1187_p5 }
  0x32   :  { %1197 = shalt.err (!%p1194_p9)
}
  0x33   :  { %s1299_s0 = smov 64   ;;  %s1300_s30 = smov 4  }
  0x34   :  { %50 = dma.hbm_to_vmem [thread:$0]  %s1509_s2, 5120, %s45_s29, [#allocation6], %s1299_s0, %s1299_s0, %s1300_s30  }
  0x35   :  { %s1301_s19 = smov [#allocation8]   ;;  %s1198_s23 = scalar_lea.hbm %s1510_s3, 2048 }
  0x36   :  { %s56_s20 = sshll.u32 %s1301_s19, 4  ;;  %p1199_p10 = scmp.ne.s32.totalorder %s1510_s3, %s1198_s23  ;;  %s57_s20 = int_to_ptr.vmem [resolvable:$true] %s56_s20 }
  0x37   :  { %p1202_p11 = scmp.lt.u32.totalorder %s1198_s23, %s1510_s3 }
  0x39   :  { %p1204_p12 = pnand %p1202_p11, %p1199_p10 }
  0x3b   :  { %1207 = shalt.err (!%p1204_p12)
}
  0x3c   :  { %s1208_s27 = scalar_lea.vmem %s57_s20, 2048  ;;  %p1213_p0 = scmp.lt.s32.totalorder %s57_s20, %s57_s20 }
  0x3d   :  { %p1209_p13 = scmp.ne.s32.totalorder %s57_s20, %s1208_s27  ;;  %p1214_p1 = scmp.lt.s32.totalorder %s1208_s27, %s1208_s27 }
  0x3f   :  { %p1215_p2 = por %p1214_p1, %p1213_p0 }
  0x41   :  { %p1216_p3 = pnand %p1215_p2, %p1209_p13 }
  0x43   :  { %1219 = shalt.err (!%p1216_p3)
}
  0x44   :  { %s1302_s2 = smov 128   ;;  %s1303_s28 = smov 8  }
  0x45   :  { %62 = dma.hbm_to_vmem [thread:$0]  %s1510_s3, 2048, %s57_s20, [#allocation9], %s1302_s2, %s1302_s2, %s1303_s28  }
  0x46   :  { %1286 = dma.done.wait [#allocation3], 128  }
  0x47   :  { %1287 = vsyncadd [#allocation3], 4294967168 }
  0x48   :  { %1288 = dma.done.wait [#allocation6], 5248  }
  0x49   :  { %1289 = vsyncadd [#allocation6], 4294962048 }
  0x4a   :  { %1290 = dma.done.wait [#allocation9], 2048  }
  0x4b   :  { %1291 = vsyncadd [#allocation9], 4294965248  ;;  %v1304_v0 = vmov 0.0   ;;  %vm1305_vm0 = vmmov 0   ;;  %v1064_v1 = vld [vmem:[#allocation7] sm:$0xff]   ;;  %v1065_v2 = vld [vmem:[#allocation7 + $0x8] sm:$0xff]  }
  0x4c   :  { %950 = vmatprep.subr.bf16.mxu0 %v1304_v0  ;;  %966 = vmatprep.mubr.msk.bf16.mxu0 %vm1305_vm0, %v1304_v0  ;;  %v1066_v3 = vld [vmem:[#allocation7 + $0x10] sm:$0xff]   ;;  %v1072_v4 = vld [vmem:[#allocation7 + $0x40] sm:$0xff]   ;;  %v1067_v5 = vld [vmem:[#allocation7 + $0x18] sm:$0xff]   ;;  %v1306_v43 = vmov 0   ;;  %s1307_s30 = smov [#allocation11]  }
  0x4d   :  { %970 = vmatprep.subr.bf16.mxu1 %v1304_v0  ;;  %986 = vmatprep.mubr.msk.bf16.mxu1 %vm1305_vm0, %v1304_v0  ;;  %v1073_v6 = vld [vmem:[#allocation7 + $0x48] sm:$0xff]   ;;  %v1068_v7 = vld [vmem:[#allocation7 + $0x20] sm:$0xff]   ;;  %v1074_v8 = vld [vmem:[#allocation7 + $0x50] sm:$0xff]   ;;  %s816_s17 = sshll.u32 %s1307_s30, 4  ;;  %s817_s17 = int_to_ptr.vmem [resolvable:$true] %s816_s17 }
  0x4e   :  { %951 = vmatpush3.bf16.msra.mxu0 %v1064_v1  ;;  %971 = vmatpush3.bf16.msra.mxu1 %v1072_v4  ;;  %v1069_v9 = vld [vmem:[#allocation7 + $0x28] sm:$0xff]   ;;  %v1075_v10 = vld [vmem:[#allocation7 + $0x58] sm:$0xff]   ;;  %v1070_v11 = vld [vmem:[#allocation7 + $0x30] sm:$0xff]   ;;  %s1220_s18 = scalar_lea.vmem %s817_s17, 128  ;;  %p1225_p5 = scmp.lt.s32.totalorder %s817_s17, %s817_s17 }
  0x4f   :  { %952 = vmatprep.subr.bf16.mxu0 %v1304_v0  ;;  %972 = vmatprep.subr.bf16.mxu1 %v1304_v0  ;;  %v1076_v12 = vld [vmem:[#allocation7 + $0x60] sm:$0xff]   ;;  %v1071_v13 = vld [vmem:[#allocation7 + $0x38] sm:$0xff]   ;;  %v80_v14 = vld [vmem:[#allocation2] sm:$0xff]  ;;  %p1221_p4 = scmp.ne.s32.totalorder %s817_s17, %s1220_s18  ;;  %p1226_p6 = scmp.lt.s32.totalorder %s1220_s18, %s1220_s18 }
  0x50   :  { %v1077_v15 = vld [vmem:[#allocation7 + $0x68] sm:$0xff]   ;;  %v82_v16 = vpack.c.bf16 %v80_v14, %v80_v14  ;;  %v1078_v17 = vld [vmem:[#allocation7 + $0x70] sm:$0xff]   ;;  %v1079_v18 = vld [vmem:[#allocation7 + $0x78] sm:$0xff]  }
  0x51   :  { %v1080_v19 = vld [vmem:[#allocation8] ss:$8 sps:$4 sm:$0xff]   ;;  %v1082_v20 = vld [vmem:[#allocation8 + $0x4] ss:$8 sps:$4 sm:$0xff]   ;;  %v1085_v21 = vld [vmem:[#allocation8 + $0x14] ss:$8 sps:$4 sm:$0xff]   ;;  %p1227_p7 = por %p1226_p6, %p1225_p5 }
  0x52   :  { %953 = vmatpush3.bf16.msra.mxu0 %v1065_v2  ;;  %973 = vmatpush3.bf16.msra.mxu1 %v1073_v6  ;;  %v1083_v22 = vld [vmem:[#allocation8 + $0x10] ss:$8 sps:$4 sm:$0xff]   ;;  %v1088_v23 = vld [vmem:[#allocation8 + $0x24] ss:$8 sps:$4 sm:$0xff]   ;;  %v1086_v24 = vld [vmem:[#allocation8 + $0x20] ss:$8 sps:$4 sm:$0xff]  }
  0x53   :  { %954 = vmatprep.subr.bf16.mxu0 %v1304_v0  ;;  %974 = vmatprep.subr.bf16.mxu1 %v1304_v0  ;;  %v1091_v25 = vld [vmem:[#allocation8 + $0x34] ss:$8 sps:$4 sm:$0xff]   ;;  %v1089_v26 = vld [vmem:[#allocation8 + $0x30] ss:$8 sps:$4 sm:$0xff]   ;;  %v1094_v27 = vld [vmem:[#allocation8 + $0x44] ss:$8 sps:$4 sm:$0xff]   ;;  %p1228_p8 = pnand %p1227_p7, %p1221_p4 }
  0x54   :  { %v1092_v28 = vld [vmem:[#allocation8 + $0x40] ss:$8 sps:$4 sm:$0xff]   ;;  %v1097_v29 = vld [vmem:[#allocation8 + $0x54] ss:$8 sps:$4 sm:$0xff]   ;;  %v1095_v30 = vld [vmem:[#allocation8 + $0x50] ss:$8 sps:$4 sm:$0xff]  }
  0x55   :  { %v1100_v31 = vld [vmem:[#allocation8 + $0x64] ss:$8 sps:$4 sm:$0xff]   ;;  %v1098_v32 = vld [vmem:[#allocation8 + $0x60] ss:$8 sps:$4 sm:$0xff]   ;;  %v844_v33 = vld [vmem:[%s1511_s4] ss:$0 sm:$0xff] }
  0x56   :  { %955 = vmatpush3.bf16.msra.mxu0 %v1066_v3  ;;  %975 = vmatpush3.bf16.msra.mxu1 %v1074_v8  ;;  %v1103_v41 = vld [vmem:[#allocation8 + $0x74] ss:$8 sps:$4 sm:$0xff]   ;;  %v1101_v42 = vld [vmem:[#allocation8 + $0x70] ss:$8 sps:$4 sm:$0xff]   ;;  %v1104_v44 = vld [vmem:[#allocation7 + $0x80] sm:$0xff]   ;;  %v324_v3 = vlaneseq }
  0x57   :  { %956 = vmatprep.subr.bf16.mxu0 %v1304_v0  ;;  %976 = vmatprep.subr.bf16.mxu1 %v1304_v0  ;;  %v1105_v45 = vld [vmem:[#allocation7 + $0x88] sm:$0xff]   ;;  %v853_v46 = vld [vmem:[%s1511_s4 + $0x1] ss:$0 sm:$0xff]  ;;  %v1107_v55 = vld [vmem:[#allocation7 + $0x98] sm:$0xff]  }
  0x58   :  { %v1106_v54 = vld [vmem:[#allocation7 + $0x90] sm:$0xff]   ;;  %v1108_v56 = vld [vmem:[#allocation7 + $0xa0] sm:$0xff]   ;;  %v1109_v57 = vld [vmem:[#allocation7 + $0xa8] sm:$0xff]   ;;  %v325_v4 = vshrl.u32 %v324_v3, 7 }
  0x59   :  { %v1110_v58 = vld [vmem:[#allocation7 + $0xb0] sm:$0xff]   ;;  %v1111_v59 = vld [vmem:[#allocation7 + $0xb8] sm:$0xff]   ;;  %v1112_v60 = vld [vmem:[#allocation7 + $0xc0] sm:$0xff]  }
  0x5a   :  { %957 = vmatpush3.bf16.msra.mxu0 %v1067_v5  ;;  %977 = vmatpush3.bf16.msra.mxu1 %v1075_v10  ;;  %v1113_v61 = vld [vmem:[#allocation7 + $0xc8] sm:$0xff]   ;;  %v1114_v62 = vld [vmem:[#allocation7 + $0xd0] sm:$0xff]   ;;  %v1115_v63 = vld [vmem:[#allocation7 + $0xd8] sm:$0xff]   ;;  %v326_v5 = vsub.s32 0, %v325_v4 }
  0x5b   :  { %958 = vmatprep.subr.bf16.mxu0 %v1304_v0  ;;  %978 = vmatprep.subr.bf16.mxu1 %v1304_v0  ;;  %v1116_v1 = vld [vmem:[#allocation7 + $0xe0] sm:$0xff]   ;;  %v1117_v2 = vld [vmem:[#allocation7 + $0xe8] sm:$0xff]   ;;  %v322_v6 = vld [vmem:[%s1512_s5] sm:$0x3] }
  0x5c   :  { %v327_v8 = vrot.slane %v322_v6, %v326_v5 }
  0x5e   :  { %959 = vmatpush3.bf16.msra.mxu0 %v1068_v7  ;;  %979 = vmatpush3.bf16.msra.mxu1 %v1076_v12  ;;  %v330_v7 = vsub.s32 1, %v325_v4 }
  0x5f   :  { %960 = vmatprep.subr.bf16.mxu0 %v1304_v0  ;;  %980 = vmatprep.subr.bf16.mxu1 %v1304_v0 }
  0x62   :  { %961 = vmatpush3.bf16.msra.mxu0 %v1069_v9  ;;  %981 = vmatpush3.bf16.msra.mxu1 %v1077_v15  ;;  %v331_v9 = vrot.slane %v322_v6, %v330_v7 }
  0x63   :  { %962 = vmatprep.subr.bf16.mxu0 %v1304_v0  ;;  %982 = vmatprep.subr.bf16.mxu1 %v1304_v0 }
  0x66   :  { %963 = vmatpush3.bf16.msra.mxu0 %v1070_v11  ;;  %983 = vmatpush3.bf16.msra.mxu1 %v1078_v17 }
  0x67   :  { %964 = vmatprep.subr.bf16.mxu0 %v1304_v0  ;;  %984 = vmatprep.subr.bf16.mxu1 %v1304_v0 }
  0x6a   :  { %965 = vmatpush3.bf16.msra.mxu0 %v1071_v13  ;;  %985 = vmatpush3.bf16.msra.mxu1 %v1079_v18  ;;  %v81_v18 = vld [vmem:[#allocation5] sm:$0xff] }
  0x6b   :  { %990 = vmatprep.subr.bf16.mxu1 %v1304_v0  ;;  %414 = vmatprep.subr.bf16.mxu0 %v1082_v20 }
  0x6d   :  { %967 = vmatmul.mubr.bf16.vlgmr.msra.gmra.mrb[0].mxu0 %v82_v16 }
  0x6e   :  { %415 = vmatpush1.bf16.msra.mxu0 %v1080_v19  ;;  %446 = vmatprep.mubr.bf16.mxu0 %v1306_v43 }
  0x6f   :  { %416 = vmatprep.subr.bf16.mxu0 %v1085_v21 }
  0x72   :  { %417 = vmatpush1.bf16.msra.mxu0 %v1083_v22 }
  0x73   :  { %418 = vmatprep.subr.bf16.mxu0 %v1088_v23  ;;  %v1118_v23 = vld [vmem:[#allocation7 + $0xf0] sm:$0xff]  }
  0x76   :  { %419 = vmatpush1.bf16.msra.mxu0 %v1086_v24  ;;  %v1119_v24 = vld [vmem:[#allocation7 + $0xf8] sm:$0xff]  }
  0x77   :  { %420 = vmatprep.subr.bf16.mxu0 %v1091_v25  ;;  %v1120_v25 = vld [vmem:[#allocation7 + $0x100] sm:$0xff]  }
  0x7a   :  { %421 = vmatpush1.bf16.msra.mxu0 %v1089_v26  ;;  %v1121_v26 = vld [vmem:[#allocation7 + $0x108] sm:$0xff]  }
  0x7b   :  { %422 = vmatprep.subr.bf16.mxu0 %v1094_v27  ;;  %v1122_v27 = vld [vmem:[#allocation7 + $0x110] sm:$0xff]  }
  0x7e   :  { %423 = vmatpush1.bf16.msra.mxu0 %v1092_v28  ;;  %v1123_v28 = vld [vmem:[#allocation7 + $0x118] sm:$0xff]  }
  0x7f   :  { %424 = vmatprep.subr.bf16.mxu0 %v1097_v29  ;;  %v1124_v29 = vld [vmem:[#allocation7 + $0x120] sm:$0xff]  }
  0x82   :  { %425 = vmatpush1.bf16.msra.mxu0 %v1095_v30  ;;  %v1125_v30 = vld [vmem:[#allocation7 + $0x128] sm:$0xff]  }
  0x83   :  { %426 = vmatprep.subr.bf16.mxu0 %v1100_v31  ;;  %v878_v31 = vld [vmem:[%s1511_s4 + $0x2] ss:$0 sm:$0xff] }
  0x86   :  { %427 = vmatpush1.bf16.msra.mxu0 %v1098_v32 }
  0x87   :  { %428 = vmatprep.subr.bf16.mxu0 %v1103_v41  ;;  %v887_v41 = vld [vmem:[%s1511_s4 + $0x3] ss:$0 sm:$0xff] }
  0x8a   :  { %429 = vmatpush1.bf16.msra.mxu0 %v1101_v42 }
  0x8b   :  { %1010 = vmatprep.subr.bf16.mxu0 %v1304_v0 }
 0x140   :  { %v186_v34 = vpop.f32.mrb[0].mxu0 }
 0x141   :  { %v187_v35 = vadd.f32 %v844_v33, %v186_v34  ;;  %v968_v36 = vpop.f32.mrb[1].mxu0 }
 0x142   :  { %v189_v37 = vpop.f32.mrb[2].mxu0 }
 0x143   :  { %v192_v38 = vmax.f32 %v187_v35, 0.0  ;;  %v969_v39 = vpop.f32.mrb[3].mxu0 }
 0x144   :  { %v1126_v39 = vld [vmem:[#allocation7 + $0x130] sm:$0xff]  }
 0x145   :  { %v193_v40 = vpack.c.bf16 %v192_v38, %v192_v38 }
 0x147   :  { %987 = vmatmul.mubr.bf16.vlgmr.msra.gmra.mrb[0].mxu1 %v193_v40  ;;  %v1127_v40 = vld [vmem:[#allocation7 + $0x138] sm:$0xff]  }
 0x148   :  { %1006 = vmatprep.mubr.msk.bf16.mxu1 %vm1305_vm0, %v1304_v0  ;;  %991 = vmatpush3.bf16.msra.mxu1 %v1104_v44 }
 0x149   :  { %992 = vmatprep.subr.bf16.mxu1 %v1304_v0 }
 0x14c   :  { %993 = vmatpush3.bf16.msra.mxu1 %v1105_v45 }
 0x14d   :  { %994 = vmatprep.subr.bf16.mxu1 %v1304_v0 }
 0x150   :  { %995 = vmatpush3.bf16.msra.mxu1 %v1106_v54 }
 0x151   :  { %996 = vmatprep.subr.bf16.mxu1 %v1304_v0 }
 0x154   :  { %997 = vmatpush3.bf16.msra.mxu1 %v1107_v55 }
 0x155   :  { %998 = vmatprep.subr.bf16.mxu1 %v1304_v0 }
 0x158   :  { %999 = vmatpush3.bf16.msra.mxu1 %v1108_v56 }
 0x159   :  { %1000 = vmatprep.subr.bf16.mxu1 %v1304_v0 }
 0x15c   :  { %1001 = vmatpush3.bf16.msra.mxu1 %v1109_v57 }
 0x15d   :  { %1002 = vmatprep.subr.bf16.mxu1 %v1304_v0 }
 0x160   :  { %1003 = vmatpush3.bf16.msra.mxu1 %v1110_v58 }
 0x161   :  { %1004 = vmatprep.subr.bf16.mxu1 %v1304_v0 }
 0x164   :  { %1005 = vmatpush3.bf16.msra.mxu1 %v1111_v59 }
 0x165   :  { %1030 = vmatprep.subr.bf16.mxu1 %v1304_v0 }
 0x21a   :  { %v298_v47 = vpop.f32.mrb[0].mxu1 }
 0x21b   :  { %v299_v48 = vadd.f32 %v853_v46, %v298_v47  ;;  %v988_v49 = vpop.f32.mrb[1].mxu1 }
 0x21c   :  { %v301_v50 = vpop.f32.mrb[2].mxu1 }
 0x21d   :  { %v304_v51 = vmax.f32 %v299_v48, 0.0  ;;  %v989_v52 = vpop.f32.mrb[3].mxu1 }
 0x21f   :  { %v305_v53 = vpack.c.bf16 %v304_v51, %v304_v51 }
 0x221   :  { %447 = vmatmul.mubr.bf16.vlgmr.msra.gmra.mrb[4].mxu0 %v305_v53 }
 0x222   :  { %1026 = vmatprep.mubr.msk.bf16.mxu0 %vm1305_vm0, %v1304_v0  ;;  %1011 = vmatpush3.bf16.msra.mxu0 %v1112_v60 }
 0x223   :  { %1012 = vmatprep.subr.bf16.mxu0 %v1304_v0 }
 0x226   :  { %1013 = vmatpush3.bf16.msra.mxu0 %v1113_v61 }
 0x227   :  { %1014 = vmatprep.subr.bf16.mxu0 %v1304_v0 }
 0x22a   :  { %1015 = vmatpush3.bf16.msra.mxu0 %v1114_v62 }
 0x22b   :  { %1016 = vmatprep.subr.bf16.mxu0 %v1304_v0 }
 0x22e   :  { %1017 = vmatpush3.bf16.msra.mxu0 %v1115_v63 }
 0x22f   :  { %1018 = vmatprep.subr.bf16.mxu0 %v1304_v0 }
 0x232   :  { %1019 = vmatpush3.bf16.msra.mxu0 %v1116_v1 }
 0x233   :  { %1020 = vmatprep.subr.bf16.mxu0 %v1304_v0 }
 0x236   :  { %1021 = vmatpush3.bf16.msra.mxu0 %v1117_v2 }
 0x237   :  { %1022 = vmatprep.subr.bf16.mxu0 %v1304_v0 }
 0x23a   :  { %1023 = vmatpush3.bf16.msra.mxu0 %v1118_v23 }
 0x23b   :  { %1024 = vmatprep.subr.bf16.mxu0 %v1304_v0 }
 0x23e   :  { %1025 = vmatpush3.bf16.msra.mxu0 %v1119_v24 }
 0x2f4   :  { %v448_v10 = vpop.f32.mrb[4].mxu0 }
 0x2f5   :  { %v449_v11 = vadd.f32 %v448_v10, %v327_v8  ;;  %v450_v12 = vpop.f32.mrb[5].mxu0 }
 0x2f6   :  { %v451_v13 = vadd.f32 %v450_v12, %v331_v9  ;;  %v452_v14 = vpop.f32.mrb[6].mxu0 }
 0x2f7   :  { %798 = vst [vmem:[#allocation11] sm:$0xff] %v449_v11  ;;  %v453_v15 = vpop.f32.mrb[7].mxu0 }
 0x2f8   :  { %v455_v16 = vmul.f32 0.5, %v451_v13  ;;  %799 = vst [vmem:[#allocation13] sm:$0xff] %v451_v13 }
 0x2fa   :  { %v456_v17 = vmul.f32 1.442695, %v455_v16 }
 0x2fc   :  { %1128 = vpow2.f32 %v456_v17 }
 0x306   :  { %v1129_v19 = vpop.eup %1128 }
 0x307   :  { %v458_v20 = vmul.f32 %v1129_v19, %v81_v18 }
 0x309   :  { %v459_v21 = vadd.f32 %v458_v20, %v449_v11 }
 0x30b   :  { %v460_v22 = vpack.c.bf16 %v459_v21, %v459_v21 }
 0x30d   :  { %1007 = vmatmul.mubr.bf16.vlgmr.msra.gmra.mrb[4].mxu1 %v460_v22 }
 0x30e   :  { %1046 = vmatprep.mubr.msk.bf16.mxu1 %vm1305_vm0, %v1304_v0  ;;  %1031 = vmatpush3.bf16.msra.mxu1 %v1120_v25 }
 0x30f   :  { %1032 = vmatprep.subr.bf16.mxu1 %v1304_v0 }
 0x312   :  { %1033 = vmatpush3.bf16.msra.mxu1 %v1121_v26 }
 0x313   :  { %1034 = vmatprep.subr.bf16.mxu1 %v1304_v0 }
 0x316   :  { %1035 = vmatpush3.bf16.msra.mxu1 %v1122_v27 }
 0x317   :  { %1036 = vmatprep.subr.bf16.mxu1 %v1304_v0 }
 0x31a   :  { %1037 = vmatpush3.bf16.msra.mxu1 %v1123_v28 }
 0x31b   :  { %1038 = vmatprep.subr.bf16.mxu1 %v1304_v0 }
 0x31e   :  { %1039 = vmatpush3.bf16.msra.mxu1 %v1124_v29 }
 0x31f   :  { %1040 = vmatprep.subr.bf16.mxu1 %v1304_v0 }
 0x322   :  { %1041 = vmatpush3.bf16.msra.mxu1 %v1125_v30 }
 0x323   :  { %1042 = vmatprep.subr.bf16.mxu1 %v1304_v0 }
 0x326   :  { %1043 = vmatpush3.bf16.msra.mxu1 %v1126_v39 }
 0x327   :  { %1044 = vmatprep.subr.bf16.mxu1 %v1304_v0 }
 0x32a   :  { %1045 = vmatpush3.bf16.msra.mxu1 %v1127_v40 }
 0x3e0   :  { %v565_v32 = vpop.f32.mrb[4].mxu1 }
 0x3e1   :  { %v566_v33 = vadd.f32 %v878_v31, %v565_v32  ;;  %v1008_v34 = vpop.f32.mrb[5].mxu1 }
 0x3e2   :  { %v568_v35 = vpop.f32.mrb[6].mxu1 }
 0x3e3   :  { %v571_v36 = vmax.f32 %v566_v33, 0.0  ;;  %v1009_v37 = vpop.f32.mrb[7].mxu1 }
 0x3e5   :  { %v572_v38 = vpack.c.bf16 %v571_v36, %v571_v36 }
 0x3e7   :  { %1027 = vmatmul.mubr.bf16.vlgmr.msra.gmra.mrb[8].mxu0 %v572_v38 }
 0x4ba   :  { %v677_v42 = vpop.f32.mrb[8].mxu0 }
 0x4bb   :  { %v678_v43 = vadd.f32 %v887_v41, %v677_v42  ;;  %v1028_v44 = vpop.f32.mrb[9].mxu0 }
 0x4bc   :  { %v680_v45 = vpop.f32.mrb[10].mxu0 }
 0x4bd   :  { %v683_v46 = vmax.f32 %v678_v43, 0.0  ;;  %v1029_v47 = vpop.f32.mrb[11].mxu0 }
 0x4bf   :  { %v684_v48 = vpack.c.bf16 %v683_v46, %v683_v46 }
 0x4c1   :  { %1047 = vmatmul.mubr.bf16.vlgmr.msra.gmra.mrb[8].mxu1 %v684_v48 }
 0x4c2   :  { %1231 = shalt.err (!%p1228_p8)
}
 0x4c3   :  { %s1232_s21 = scalar_lea.hbm %s1514_s7, 128 }
 0x4c4   :  { %p1233_p9 = scmp.ne.s32.totalorder %s1514_s7, %s1232_s21  ;;  %p1236_p10 = scmp.lt.u32.totalorder %s1232_s21, %s1514_s7 }
 0x4c6   :  { %p1238_p11 = pnand %p1236_p10, %p1233_p9 }
 0x4c8   :  { %1241 = shalt.err (!%p1238_p11)
}
 0x4c9   :  { %819 = dma.vmem_to_hbm [thread:$0]  %s817_s17, 128, %s1514_s7, [#allocation12]  }
 0x4ca   :  { %s1308_s27 = smov [#allocation13]  }
 0x4cb   :  { %s826_s2 = sshll.u32 %s1308_s27, 4  ;;  %s827_s2 = int_to_ptr.vmem [resolvable:$true] %s826_s2 }
 0x4cc   :  { %s1242_s28 = scalar_lea.vmem %s827_s2, 128  ;;  %p1247_p13 = scmp.lt.s32.totalorder %s827_s2, %s827_s2 }
 0x4cd   :  { %p1243_p12 = scmp.ne.s32.totalorder %s827_s2, %s1242_s28  ;;  %p1248_p0 = scmp.lt.s32.totalorder %s1242_s28, %s1242_s28 }
 0x4cf   :  { %p1249_p1 = por %p1248_p0, %p1247_p13 }
 0x4d1   :  { %p1250_p2 = pnand %p1249_p1, %p1243_p12 }
 0x4d3   :  { %1253 = shalt.err (!%p1250_p2)
}
 0x4d4   :  { %s1254_s3 = scalar_lea.hbm %s1515_s8, 128 }
 0x4d5   :  { %p1255_p3 = scmp.ne.s32.totalorder %s1515_s8, %s1254_s3  ;;  %p1258_p4 = scmp.lt.u32.totalorder %s1254_s3, %s1515_s8 }
 0x4d7   :  { %p1260_p5 = pnand %p1258_p4, %p1255_p3 }
 0x4d9   :  { %1263 = shalt.err (!%p1260_p5)
}
 0x4da   :  { %829 = dma.vmem_to_hbm [thread:$0]  %s827_s2, 128, %s1515_s8, [#allocation12]   ;;  %v896_v0 = vld [vmem:[%s1511_s4 + $0x4] ss:$0 sm:$0xff] }
 0x4db   :  { %s1309_s16 = smov [#allocation10]  }
 0x4dc   :  { %s806_s0 = sshll.u32 %s1309_s16, 4  ;;  %s807_s0 = int_to_ptr.vmem [resolvable:$true] %s806_s0 }
 0x4dd   :  { %s1264_s30 = scalar_lea.vmem %s807_s0, 128  ;;  %p1269_p7 = scmp.lt.s32.totalorder %s807_s0, %s807_s0 }
 0x4de   :  { %p1265_p6 = scmp.ne.s32.totalorder %s807_s0, %s1264_s30  ;;  %p1270_p8 = scmp.lt.s32.totalorder %s1264_s30, %s1264_s30 }
 0x4e0   :  { %p1271_p9 = por %p1270_p8, %p1269_p7 }
 0x4e2   :  { %p1272_p10 = pnand %p1271_p9, %p1265_p6 }
 0x594   :  { %v789_v49 = vpop.f32.mrb[8].mxu1 }
 0x595   :  { %v790_v50 = vadd.f32 %v896_v0, %v789_v49  ;;  %v1048_v51 = vpop.f32.mrb[9].mxu1 }
 0x596   :  { %v792_v52 = vpop.f32.mrb[10].mxu1 }
 0x597   :  { %v795_v53 = vmul.f32 0.5, %v790_v50  ;;  %v1049_v54 = vpop.f32.mrb[11].mxu1 }
 0x599   :  { %1130 = vtanh.f32 %v795_v53 }
 0x5a3   :  { %v1131_v55 = vpop.eup %1130 }
 0x5a4   :  { %797 = vst [vmem:[#allocation10] sm:$0xff] %v1131_v55 }
 0x5a5   :  { %1275 = shalt.err (!%p1272_p10)
}
 0x5a6   :  { %s1276_s17 = scalar_lea.hbm %s1513_s6, 128 }
 0x5a7   :  { %p1277_p11 = scmp.ne.s32.totalorder %s1513_s6, %s1276_s17  ;;  %p1280_p12 = scmp.lt.u32.totalorder %s1276_s17, %s1513_s6 }
 0x5a9   :  { %p1282_p13 = pnand %p1280_p12, %p1277_p11 }
 0x5ab   :  { %1285 = shalt.err (!%p1282_p13)
}
 0x5ac   :  { %809 = dma.vmem_to_hbm [thread:$0]  %s807_s0, 128, %s1513_s6, [#allocation4]  }
 0x5ad   :  { %1292 = dma.done.wait [#allocation4], 128  }
 0x5ae   :  { %1293 = vsyncadd [#allocation4], 4294967168 }
 0x5af   :  { %1294 = dma.done.wait [#allocation12], 256  }
 0x5b0   :  { %1295 = vsyncadd [#allocation12], 4294967040 }
 0x5b1   :  { %839 = vsyncpa [#allocation3], 1 }
 0x5b2   :  { %840 = vsyncpa [#allocation6], 1 }
 0x5b3   :  { %841 = vsyncpa [#allocation9], 1 }
 0x5b4   :  { %842 = vsyncpa [#allocation4], 1 }
 0x5b5   :  { %843 = vsyncpa [#allocation12], 1 }

</bundles_post_ra>
